<compile_context>
chip_gen: v7x
topology: tpu7x:2x2x1
jax: 0.10.0
libtpu: 0.0.40
codegen_flags: <defaults>
</compile_context>

<pallas_src>
import functools

import jax
import jax.numpy as jnp
from jax.experimental import pallas as pl
from jax.experimental.pallas import tpu as pltpu

_LANE = 128
_SUBLANE = 8


def _round_up(a, b):
    return (a + b - 1) // b * b


def _tpu_vmem_capacity_bytes():
    """Best-effort VMEM capacity query; conservative (v7x-sized) fallback."""
    try:
        info = pltpu.get_tpu_info()
        cap = getattr(info, "vmem_capacity_bytes", None)
        if cap:
            return int(cap)
    except Exception:
        pass
    return 64 << 20


def _outconv_kernel(x_ref, scale_ref, shift_ref, w_ref, bias_ref, o_ref):
    # x_ref:     (C, TR, 128)       VMEM  spatial slab per input channel
    # scale_ref: (C,)               SMEM  folded BN scale = gamma / sqrt(var + eps)
    # shift_ref: (C,)               SMEM  folded BN shift = beta - mean * scale
    # w_ref:     (out_ch * C,)      SMEM  conv weight, flat: w[o * C + c]
    # bias_ref:  (out_ch,)          SMEM  conv bias
    # o_ref:     (out_ch, TR, 128)  VMEM
    C = x_ref.shape[0]
    out_ch = o_ref.shape[0]
    slab = x_ref.shape[1:]

    # Accumulators start at the conv bias (bias folded into init — no extra pass).
    accs = [jnp.full(slab, bias_ref[o], dtype=jnp.float32) for o in range(out_ch)]

    for c in range(C):                                    # C is tiny & static
        y = x_ref[c] * scale_ref[c] + shift_ref[c]        # BatchNorm3d (folded, eval)
        y = jnp.maximum(y, 0.1 * y)                       # LeakyReLU(0.1), single VPU op
        for o in range(out_ch):                           # out_ch is tiny & static
            accs[o] = accs[o] + y * w_ref[o * C + c]      # scalar-broadcast FMA

    for o in range(out_ch):                               # direct lane-dense row stores
        o_ref[o] = accs[o].astype(o_ref.dtype)


@functools.partial(jax.jit, static_argnames=("tile_r", "vmem_limit"))
def _outconv_impl(x4, scale, shift, w_flat, bias, *, tile_r, vmem_limit):
    N, C, R, L = x4.shape
    out_ch = bias.shape[0]
    grid = (N, pl.cdiv(R, tile_r))

    return pl.pallas_call(
        _outconv_kernel,
        out_shape=jax.ShapeDtypeStruct((N, out_ch, R, L), jnp.float32),
        grid_spec=pltpu.PrefetchScalarGridSpec(
            num_scalar_prefetch=0,
            grid=grid,
            in_specs=[
                pl.BlockSpec((None, C, tile_r, L), lambda n, t: (n, 0, t, 0)),
                pl.BlockSpec(memory_space=pltpu.MemorySpace.SMEM),   # scale
                pl.BlockSpec(memory_space=pltpu.MemorySpace.SMEM),   # shift
                pl.BlockSpec(memory_space=pltpu.MemorySpace.SMEM),   # conv weight (flat)
                pl.BlockSpec(memory_space=pltpu.MemorySpace.SMEM),   # conv bias
            ],
            out_specs=pl.BlockSpec((None, out_ch, tile_r, L),
                                   lambda n, t: (n, 0, t, 0)),
        ),
        compiler_params=pltpu.CompilerParams(
            dimension_semantics=("parallel", "parallel"),
            vmem_limit_bytes=vmem_limit,
        ),
    )(x4, scale, shift, w_flat, bias)


def outconv_forward(x, conv_w, conv_b, bn_gamma, bn_beta, bn_mean, bn_var, eps=1e-5):
    """x: (N, C, D, H, W) float32; conv_w: (out_ch, in_ch, 1, 1, 1)."""
    N, C, D, H, W = x.shape
    out_ch = conv_w.shape[0]
    dhw = D * H * W

    # Fold BatchNorm3d (eval mode) into per-channel scale / shift.
    # TODO(synk): training-mode batch-statistics update has no kernel equivalent here.
    scale = (bn_gamma.astype(jnp.float32)
             * jax.lax.rsqrt(bn_var.astype(jnp.float32) + eps))          # (C,)
    shift = bn_beta.astype(jnp.float32) - bn_mean.astype(jnp.float32) * scale

    w_flat = conv_w.reshape(out_ch * C).astype(jnp.float32)              # w[o*C + c]
    bias = conv_b.astype(jnp.float32)

    # Free reshape to (N, C, dhw); pad DHW up to a lane multiple only if ragged, so the
    # spatial axis maps onto full (sublane, lane) vregs with lane-dense loads & stores.
    x3 = x.reshape(N, C, dhw).astype(jnp.float32)
    dhw_p = _round_up(dhw, _LANE)
    if dhw_p != dhw:
        x3 = jnp.pad(x3, ((0, 0), (0, 0), (0, dhw_p - dhw)))
    R = dhw_p // _LANE
    x4 = x3.reshape(N, C, R, _LANE)

    # ---- static, generation-aware tile selection --------------------------------
    vmem_cap = _tpu_vmem_capacity_bytes()
    if vmem_cap <= (64 << 20):          # v7x-class core: 64 MiB physical VMEM
        target_r, vmem_cap_limit = 1024, 36 << 20
    else:                               # v5e / v6e: 128 MiB VMEM -> bigger tiles
        target_r, vmem_cap_limit = 2048, 64 << 20

    if R <= target_r:
        tile_r = R                      # full extent — always a legal block dim
    else:
        tile_r = (target_r // _SUBLANE) * _SUBLANE

    # Ensure >= 2 grid programs so both v7x TensorCores get work (no-op on v5e/v6e).
    if N * pl.cdiv(R, tile_r) < 2 and R >= 2 * _SUBLANE:
        tile_r = _round_up(pl.cdiv(R, 2), _SUBLANE)

    # VMEM budget from real slab sizes: double-buffered in/out tiles + accumulators.
    per_buf = tile_r * _LANE * 4 * (C + out_ch)          # one in+out buffer set
    scratch = tile_r * _LANE * 4 * (out_ch + 1)          # accs + live y slab
    vmem_limit = int(min(vmem_cap_limit,
                         max(32 << 20, 2 * per_buf + scratch + (1 << 20))))

    out4 = _outconv_impl(x4, scale, shift, w_flat, bias,
                         tile_r=int(tile_r), vmem_limit=vmem_limit)

    out3 = out4.reshape(N, out_ch, dhw_p)
    if dhw_p != dhw:
        out3 = out3[:, :, :dhw]
    return out3.reshape(N, out_ch, D, H, W)


def _reference(x, conv_w, conv_b, bn_gamma, bn_beta, bn_mean, bn_var, eps=1e-5):
    scale = bn_gamma * jax.lax.rsqrt(bn_var + eps)
    shift = bn_beta - bn_mean * scale
    y = x * scale[None, :, None, None, None] + shift[None, :, None, None, None]
    y = jnp.where(y >= 0, y, 0.1 * y)
    w2d = conv_w.reshape(conv_w.shape[0], conv_w.shape[1])
    out = jnp.einsum("ncdhw,oc->nodhw", y, w2d) + conv_b[None, :, None, None, None]
    return out


if __name__ == "__main__":
    key = jax.random.PRNGKey(0)
    k_x, k_w, k_b, k_g, k_be, k_m, k_v = jax.random.split(key, 7)

    N, in_ch, out_ch = 2, 4, 3
    D, H, W = 4, 8, 8

    x = jax.random.normal(k_x, (N, in_ch, D, H, W), dtype=jnp.float32)
    conv_w = 0.1 * jax.random.normal(k_w, (out_ch, in_ch, 1, 1, 1), dtype=jnp.float32)
    conv_b = 0.1 * jax.random.normal(k_b, (out_ch,), dtype=jnp.float32)
    bn_gamma = 1.0 + 0.1 * jax.random.normal(k_g, (in_ch,), dtype=jnp.float32)
    bn_beta = 0.1 * jax.random.normal(k_be, (in_ch,), dtype=jnp.float32)
    bn_mean = 0.1 * jax.random.normal(k_m, (in_ch,), dtype=jnp.float32)
    bn_var = jnp.abs(1.0 + 0.1 * jax.random.normal(k_v, (in_ch,), dtype=jnp.float32))

    out = outconv_forward(x, conv_w, conv_b, bn_gamma, bn_beta, bn_mean, bn_var)
    out = jax.block_until_ready(out)

    ref = _reference(x, conv_w, conv_b, bn_gamma, bn_beta, bn_mean, bn_var)
    assert out.shape == (N, out_ch, D, H, W)
    assert jnp.max(jnp.abs(out - ref)) < 1e-4

    print("KERNEL_OK")
</pallas_src>

<mosaic_0001>
module attributes {stable_mosaic.version = 11 : i64} {
  func.func @_outconv_kernel(%arg0: i32, %arg1: i32, %arg2: memref<1x4x2x128xf32, #tpu.memory_space<vmem>>, %arg3: memref<4xf32, #tpu.memory_space<smem>>, %arg4: memref<4xf32, #tpu.memory_space<smem>>, %arg5: memref<12xf32, #tpu.memory_space<smem>>, %arg6: memref<3xf32, #tpu.memory_space<smem>>, %arg7: memref<1x3x2x128xf32, #tpu.memory_space<vmem>>) attributes {dimension_semantics = [#tpu.dimension_semantics<parallel>, #tpu.dimension_semantics<parallel>], iteration_bounds = array<i64: 2, 1>, scalar_prefetch = 0 : i64, scratch_operands = 0 : i64, tpu.core_type = #tpu.core_type<tc>, window_params = [{transform_indices = @transform_0, window_bounds = array<i64: 1, 4, 2, 128>}, {transform_indices = @transform_1, window_bounds = array<i64: 4>}, {transform_indices = @transform_2, window_bounds = array<i64: 4>}, {transform_indices = @transform_3, window_bounds = array<i64: 12>}, {transform_indices = @transform_4, window_bounds = array<i64: 3>}, {transform_indices = @transform_5, window_bounds = array<i64: 1, 3, 2, 128>}]} {
    %c0 = arith.constant 0 : index
    %0 = memref.load %arg6[%c0] : memref<3xf32, #tpu.memory_space<smem>>
    %1 = vector.broadcast %0 : f32 to vector<2x128xf32>
    %c1 = arith.constant 1 : index
    %2 = memref.load %arg6[%c1] : memref<3xf32, #tpu.memory_space<smem>>
    %3 = vector.broadcast %2 : f32 to vector<2x128xf32>
    %c2 = arith.constant 2 : index
    %4 = memref.load %arg6[%c2] : memref<3xf32, #tpu.memory_space<smem>>
    %5 = vector.broadcast %4 : f32 to vector<2x128xf32>
    %c0_0 = arith.constant 0 : index
    %c0_1 = arith.constant 0 : index
    %c0_2 = arith.constant 0 : index
    %c0_3 = arith.constant 0 : index
    %6 = vector.load %arg2[%c0_0, %c0_1, %c0_2, %c0_3] : memref<1x4x2x128xf32, #tpu.memory_space<vmem>>, vector<1x1x2x128xf32>
    %7 = vector.shape_cast %6 : vector<1x1x2x128xf32> to vector<2x128xf32>
    %c0_4 = arith.constant 0 : index
    %8 = memref.load %arg3[%c0_4] : memref<4xf32, #tpu.memory_space<smem>>
    %9 = vector.broadcast %8 : f32 to vector<2x128xf32>
    %10 = arith.mulf %7, %9 : vector<2x128xf32>
    %c0_5 = arith.constant 0 : index
    %11 = memref.load %arg4[%c0_5] : memref<4xf32, #tpu.memory_space<smem>>
    %12 = vector.broadcast %11 : f32 to vector<2x128xf32>
    %13 = arith.addf %10, %12 : vector<2x128xf32>
    %cst = arith.constant 1.000000e-01 : f32
    %14 = vector.broadcast %cst : f32 to vector<2x128xf32>
    %15 = arith.mulf %14, %13 : vector<2x128xf32>
    %16 = arith.maximumf %13, %15 : vector<2x128xf32>
    %c0_6 = arith.constant 0 : index
    %17 = memref.load %arg5[%c0_6] : memref<12xf32, #tpu.memory_space<smem>>
    %18 = vector.broadcast %17 : f32 to vector<2x128xf32>
    %19 = arith.mulf %16, %18 : vector<2x128xf32>
    %20 = arith.addf %1, %19 : vector<2x128xf32>
    %c4 = arith.constant 4 : index
    %21 = memref.load %arg5[%c4] : memref<12xf32, #tpu.memory_space<smem>>
    %22 = vector.broadcast %21 : f32 to vector<2x128xf32>
    %23 = arith.mulf %16, %22 : vector<2x128xf32>
    %24 = arith.addf %3, %23 : vector<2x128xf32>
    %c8 = arith.constant 8 : index
    %25 = memref.load %arg5[%c8] : memref<12xf32, #tpu.memory_space<smem>>
    %26 = vector.broadcast %25 : f32 to vector<2x128xf32>
    %27 = arith.mulf %16, %26 : vector<2x128xf32>
    %28 = arith.addf %5, %27 : vector<2x128xf32>
    %c0_7 = arith.constant 0 : index
    %c1_8 = arith.constant 1 : index
    %c0_9 = arith.constant 0 : index
    %c0_10 = arith.constant 0 : index
    %29 = vector.load %arg2[%c0_7, %c1_8, %c0_9, %c0_10] : memref<1x4x2x128xf32, #tpu.memory_space<vmem>>, vector<1x1x2x128xf32>
    %30 = vector.shape_cast %29 : vector<1x1x2x128xf32> to vector<2x128xf32>
    %c1_11 = arith.constant 1 : index
    %31 = memref.load %arg3[%c1_11] : memref<4xf32, #tpu.memory_space<smem>>
    %32 = vector.broadcast %31 : f32 to vector<2x128xf32>
    %33 = arith.mulf %30, %32 : vector<2x128xf32>
    %c1_12 = arith.constant 1 : index
    %34 = memref.load %arg4[%c1_12] : memref<4xf32, #tpu.memory_space<smem>>
    %35 = vector.broadcast %34 : f32 to vector<2x128xf32>
    %36 = arith.addf %33, %35 : vector<2x128xf32>
    %cst_13 = arith.constant 1.000000e-01 : f32
    %37 = vector.broadcast %cst_13 : f32 to vector<2x128xf32>
    %38 = arith.mulf %37, %36 : vector<2x128xf32>
    %39 = arith.maximumf %36, %38 : vector<2x128xf32>
    %c1_14 = arith.constant 1 : index
    %40 = memref.load %arg5[%c1_14] : memref<12xf32, #tpu.memory_space<smem>>
    %41 = vector.broadcast %40 : f32 to vector<2x128xf32>
    %42 = arith.mulf %39, %41 : vector<2x128xf32>
    %43 = arith.addf %20, %42 : vector<2x128xf32>
    %c5 = arith.constant 5 : index
    %44 = memref.load %arg5[%c5] : memref<12xf32, #tpu.memory_space<smem>>
    %45 = vector.broadcast %44 : f32 to vector<2x128xf32>
    %46 = arith.mulf %39, %45 : vector<2x128xf32>
    %47 = arith.addf %24, %46 : vector<2x128xf32>
    %c9 = arith.constant 9 : index
    %48 = memref.load %arg5[%c9] : memref<12xf32, #tpu.memory_space<smem>>
    %49 = vector.broadcast %48 : f32 to vector<2x128xf32>
    %50 = arith.mulf %39, %49 : vector<2x128xf32>
    %51 = arith.addf %28, %50 : vector<2x128xf32>
    %c0_15 = arith.constant 0 : index
    %c2_16 = arith.constant 2 : index
    %c0_17 = arith.constant 0 : index
    %c0_18 = arith.constant 0 : index
    %52 = vector.load %arg2[%c0_15, %c2_16, %c0_17, %c0_18] : memref<1x4x2x128xf32, #tpu.memory_space<vmem>>, vector<1x1x2x128xf32>
    %53 = vector.shape_cast %52 : vector<1x1x2x128xf32> to vector<2x128xf32>
    %c2_19 = arith.constant 2 : index
    %54 = memref.load %arg3[%c2_19] : memref<4xf32, #tpu.memory_space<smem>>
    %55 = vector.broadcast %54 : f32 to vector<2x128xf32>
    %56 = arith.mulf %53, %55 : vector<2x128xf32>
    %c2_20 = arith.constant 2 : index
    %57 = memref.load %arg4[%c2_20] : memref<4xf32, #tpu.memory_space<smem>>
    %58 = vector.broadcast %57 : f32 to vector<2x128xf32>
    %59 = arith.addf %56, %58 : vector<2x128xf32>
    %cst_21 = arith.constant 1.000000e-01 : f32
    %60 = vector.broadcast %cst_21 : f32 to vector<2x128xf32>
    %61 = arith.mulf %60, %59 : vector<2x128xf32>
    %62 = arith.maximumf %59, %61 : vector<2x128xf32>
    %c2_22 = arith.constant 2 : index
    %63 = memref.load %arg5[%c2_22] : memref<12xf32, #tpu.memory_space<smem>>
    %64 = vector.broadcast %63 : f32 to vector<2x128xf32>
    %65 = arith.mulf %62, %64 : vector<2x128xf32>
    %66 = arith.addf %43, %65 : vector<2x128xf32>
    %c6 = arith.constant 6 : index
    %67 = memref.load %arg5[%c6] : memref<12xf32, #tpu.memory_space<smem>>
    %68 = vector.broadcast %67 : f32 to vector<2x128xf32>
    %69 = arith.mulf %62, %68 : vector<2x128xf32>
    %70 = arith.addf %47, %69 : vector<2x128xf32>
    %c10 = arith.constant 10 : index
    %71 = memref.load %arg5[%c10] : memref<12xf32, #tpu.memory_space<smem>>
    %72 = vector.broadcast %71 : f32 to vector<2x128xf32>
    %73 = arith.mulf %62, %72 : vector<2x128xf32>
    %74 = arith.addf %51, %73 : vector<2x128xf32>
    %c0_23 = arith.constant 0 : index
    %c3 = arith.constant 3 : index
    %c0_24 = arith.constant 0 : index
    %c0_25 = arith.constant 0 : index
    %75 = vector.load %arg2[%c0_23, %c3, %c0_24, %c0_25] : memref<1x4x2x128xf32, #tpu.memory_space<vmem>>, vector<1x1x2x128xf32>
    %76 = vector.shape_cast %75 : vector<1x1x2x128xf32> to vector<2x128xf32>
    %c3_26 = arith.constant 3 : index
    %77 = memref.load %arg3[%c3_26] : memref<4xf32, #tpu.memory_space<smem>>
    %78 = vector.broadcast %77 : f32 to vector<2x128xf32>
    %79 = arith.mulf %76, %78 : vector<2x128xf32>
    %c3_27 = arith.constant 3 : index
    %80 = memref.load %arg4[%c3_27] : memref<4xf32, #tpu.memory_space<smem>>
    %81 = vector.broadcast %80 : f32 to vector<2x128xf32>
    %82 = arith.addf %79, %81 : vector<2x128xf32>
    %cst_28 = arith.constant 1.000000e-01 : f32
    %83 = vector.broadcast %cst_28 : f32 to vector<2x128xf32>
    %84 = arith.mulf %83, %82 : vector<2x128xf32>
    %85 = arith.maximumf %82, %84 : vector<2x128xf32>
    %c3_29 = arith.constant 3 : index
    %86 = memref.load %arg5[%c3_29] : memref<12xf32, #tpu.memory_space<smem>>
    %87 = vector.broadcast %86 : f32 to vector<2x128xf32>
    %88 = arith.mulf %85, %87 : vector<2x128xf32>
    %89 = arith.addf %66, %88 : vector<2x128xf32>
    %c7 = arith.constant 7 : index
    %90 = memref.load %arg5[%c7] : memref<12xf32, #tpu.memory_space<smem>>
    %91 = vector.broadcast %90 : f32 to vector<2x128xf32>
    %92 = arith.mulf %85, %91 : vector<2x128xf32>
    %93 = arith.addf %70, %92 : vector<2x128xf32>
    %c11 = arith.constant 11 : index
    %94 = memref.load %arg5[%c11] : memref<12xf32, #tpu.memory_space<smem>>
    %95 = vector.broadcast %94 : f32 to vector<2x128xf32>
    %96 = arith.mulf %85, %95 : vector<2x128xf32>
    %97 = arith.addf %74, %96 : vector<2x128xf32>
    %c0_30 = arith.constant 0 : index
    %c0_31 = arith.constant 0 : index
    %c0_32 = arith.constant 0 : index
    %c0_33 = arith.constant 0 : index
    %98 = vector.load %arg7[%c0_30, %c0_31, %c0_32, %c0_33] : memref<1x3x2x128xf32, #tpu.memory_space<vmem>>, vector<1x1x2x128xf32>
    %99 = vector.shape_cast %98 : vector<1x1x2x128xf32> to vector<2x128xf32>
    %100 = vector.shape_cast %89 : vector<2x128xf32> to vector<1x1x2x128xf32>
    tpu.vector_store %arg7[%c0_30, %c0_31, %c0_32, %c0_33], %100 {strides = array<i32>} : memref<1x3x2x128xf32, #tpu.memory_space<vmem>>, vector<1x1x2x128xf32>,
    %c0_34 = arith.constant 0 : index
    %c1_35 = arith.constant 1 : index
    %c0_36 = arith.constant 0 : index
    %c0_37 = arith.constant 0 : index
    %101 = vector.load %arg7[%c0_34, %c1_35, %c0_36, %c0_37] : memref<1x3x2x128xf32, #tpu.memory_space<vmem>>, vector<1x1x2x128xf32>
    %102 = vector.shape_cast %101 : vector<1x1x2x128xf32> to vector<2x128xf32>
    %103 = vector.shape_cast %93 : vector<2x128xf32> to vector<1x1x2x128xf32>
    tpu.vector_store %arg7[%c0_34, %c1_35, %c0_36, %c0_37], %103 {strides = array<i32>} : memref<1x3x2x128xf32, #tpu.memory_space<vmem>>, vector<1x1x2x128xf32>,
    %c0_38 = arith.constant 0 : index
    %c2_39 = arith.constant 2 : index
    %c0_40 = arith.constant 0 : index
    %c0_41 = arith.constant 0 : index
    %104 = vector.load %arg7[%c0_38, %c2_39, %c0_40, %c0_41] : memref<1x3x2x128xf32, #tpu.memory_space<vmem>>, vector<1x1x2x128xf32>
    %105 = vector.shape_cast %104 : vector<1x1x2x128xf32> to vector<2x128xf32>
    %106 = vector.shape_cast %97 : vector<2x128xf32> to vector<1x1x2x128xf32>
    tpu.vector_store %arg7[%c0_38, %c2_39, %c0_40, %c0_41], %106 {strides = array<i32>} : memref<1x3x2x128xf32, #tpu.memory_space<vmem>>, vector<1x1x2x128xf32>,
    return
  }
  func.func @transform_0(%arg0: i32, %arg1: i32) -> (i32, i32, i32, i32) {
    %c0_i32 = arith.constant 0 : i32
    %c0_i32_0 = arith.constant 0 : i32
    %c0_i32_1 = arith.constant 0 : i32
    return %arg0, %c0_i32, %arg1, %c0_i32_0 : i32, i32, i32, i32
  }
  func.func @transform_1(%arg0: i32, %arg1: i32) -> i32 {
    %c0_i32 = arith.constant 0 : i32
    %c0_i32_0 = arith.constant 0 : i32
    return %c0_i32 : i32
  }
  func.func @transform_2(%arg0: i32, %arg1: i32) -> i32 {
    %c0_i32 = arith.constant 0 : i32
    %c0_i32_0 = arith.constant 0 : i32
    return %c0_i32 : i32
  }
  func.func @transform_3(%arg0: i32, %arg1: i32) -> i32 {
    %c0_i32 = arith.constant 0 : i32
    %c0_i32_0 = arith.constant 0 : i32
    return %c0_i32 : i32
  }
  func.func @transform_4(%arg0: i32, %arg1: i32) -> i32 {
    %c0_i32 = arith.constant 0 : i32
    %c0_i32_0 = arith.constant 0 : i32
    return %c0_i32 : i32
  }
  func.func @transform_5(%arg0: i32, %arg1: i32) -> (i32, i32, i32, i32) {
    %c0_i32 = arith.constant 0 : i32
    %c0_i32_0 = arith.constant 0 : i32
    %c0_i32_1 = arith.constant 0 : i32
    return %arg0, %c0_i32, %arg1, %c0_i32_0 : i32, i32, i32, i32
  }
}

</mosaic_0001>

<bundles_post_ra>
// kernel: _outconv_impl.1
= control target key start
LH: loop header
LB: loop body
LE: loop exit
PB: predicated region body
PF: predicated region fallthrough
CT: control target
= control target key end

     0   :  { %s1243_s0 = inlined_call_operand.hbm [shape: f32[2,4,2,128], index: 0, kind: input, shape index: {}]   ;;  %s1244_s1 = inlined_call_operand.vmem [shape: f32[4], index: 1, kind: input, shape index: {}]   ;;  %s1245_s2 = inlined_call_operand.vmem [shape: f32[4], index: 2, kind: input, shape index: {}]   ;;  %s1246_s3 = inlined_call_operand.vmem [shape: f32[12], index: 3, kind: input, shape index: {}]   ;;  %s1247_s4 = inlined_call_operand.vmem [shape: f32[3], index: 4, kind: input, shape index: {}]   ;;  %s1248_s5 = inlined_call_operand.hbm [shape: f32[2,3,2,128], index: 5, kind: output, shape index: {}]  }
   0x1   :  { %1253 = sst [smem:[#allocation18_spill]] %s1243_s0 }
   0x2   :  { %1254 = sst [smem:[#allocation19_spill]] %s1244_s1 }
   0x3   :  { %1255 = sst [smem:[#allocation20_spill]] %s1245_s2 }
   0x4   :  { %10 = vsyncpa [#allocation3], 0 }
   0x5   :  { %12 = vsyncpa [#allocation3 + $0x1], 0 }
   0x6   :  { %13 = vsyncpa [#allocation5], 0 }
   0x7   :  { %14 = vsyncpa [#allocation8], 0 }
   0x8   :  { %15 = vsyncpa [#allocation11], 0 }
   0x9   :  { %16 = vsyncpa [#allocation4], 0 }
   0xa   :  { %18 = vsyncpa [#allocation4 + $0x1], 0  ;;  %s931_s18 = smov 0   ;;  %s933_s19 = smov 0  }
   0xb   :  { %s935_s20 = smov 0   ;;  %s937_s21 = smov 0  }
   0xc   :  { %s939_s22 = smov 0   ;;  %s941_s23 = smov 0  }
   0xd LB: > { %s551_s24 = sadd.s32 4294967295, %s889_s23   ;;  %s552_s25 = sadd.s32 4294967294, %s889_s23   ;;  %s889_s23 = sphi %s941_s23, %s24_s23   ;;  %s885_s22 = sphi %s939_s22, %s1277_s22   ;;  %s881_s21 = sphi %s937_s21, %s1276_s21   ;;  %s877_s20 = sphi %s935_s20, %s1275_s20   ;;  %s873_s19 = sphi %s933_s19, %s1274_s19   ;;  %s869_s18 = sphi %s931_s18, %s1273_s18  }
   0xe   : > { %p58_p0 = scmp.ne.s32.totalorder %s873_s19, %s869_s18  ;;  %p965_p1 = scmp.eq.s32.totalorder %s551_s24, 0 }
   0xf   : > { %p969_p2 = scmp.eq.s32.totalorder %s551_s24, 1  ;;  %p174_p3 = scmp.eq.s32.totalorder %s552_s25, 1 }
  0x10   : > { %s1256_s26 = scalar_select %p965_p1, 1, 0 }
  0x11   : > { %s1257_s27 = scalar_select %p969_p2, 1, 0 }
  0x12   : > { %p975_p4 = por %p965_p1, %p58_p0  ;;  %p553_p5 = scmp.ge.s32.totalorder %s889_s23, 1 }
  0x13   : > { %p980_p6 = por %p174_p3, %p58_p0  ;;  %p181_p7 = scmp.lt.s32.totalorder %s889_s23, 3 }
  0x14   : > { %s1258_s28 = scalar_select %p975_p4, 1, 0 }
  0x15   : > { %s1259_s29 = scalar_select %p980_p6, 1, 0 }
  0x16   : > { %s1260_s2 = sld [smem:[#allocation20_spill]]  ;;  %p988_p8 = pnand %p553_p5, %p181_p7 }
  0x17   : > { %s1262_s1 = sld [smem:[#allocation19_spill]]  ;;  %s216_s15 = sshll.u32 %s1246_s3, 4  ;;  %s1007_s15 = int_to_ptr.vmem [resolvable:$true] %s216_s15 }
  0x18   : > { %s1261_s8 = scalar_select %p988_p8, 1, 0 }
  0x19   : > { %p618_p10 = pneg %p988_p8 }
  0x1b   : > { %p1000_p11 = pnand %p618_p10, %p965_p1 }
  0x1c   : > { %s205_s7 = sshll.u32 %s1260_s2, 4  ;;  %s206_s7 = int_to_ptr.vmem [resolvable:$true] %s205_s7 }
  0x1d   : > { %s194_s11 = sshll.u32 %s1262_s1, 4  ;;  %s705_s16 = scalar_lea.vmem %s206_s7, 16  ;;  %s195_s11 = int_to_ptr.vmem [resolvable:$true] %s194_s11 }
  0x1e   : > { %p706_p12 = scmp.ne.s32.totalorder %s206_s7, %s705_s16  ;;  %p707_p13 = pneg %p1000_p11 }
  0x1f   : > { %p713_p5 = scmp.lt.s32.totalorder %s206_s7, %s206_s7  ;;  %p714_p7 = scmp.lt.s32.totalorder %s705_s16, %s705_s16 }
  0x20   : > { %p708_p0 = pnand %p707_p13, %p706_p12 }
  0x21   : > { %p715_p10 = por %p714_p7, %p713_p5 }
  0x22   : > { %p709_p3 = pneg %p708_p0 }
  0x24   : > { %p716_p9 = pnand %p715_p10, %p709_p3 }
  0x26   : > { %719 = shalt.err (!%p716_p9)
}
  0x27   : > { %s891_s17 = smov [#allocation7]   ;;  %s720_s24 = scalar_lea.vmem %s195_s11, 16 }
  0x28   : > { %624 = dma.vmem_to_smem (!%p1000_p11), %s206_s7, 16, %s891_s17, [#allocation8]  }
  0x29   : > { %p721_p6 = scmp.ne.s32.totalorder %s195_s11, %s720_s24  ;;  %p728_p8 = scmp.lt.s32.totalorder %s195_s11, %s195_s11 }
  0x2a   : > { %p729_p2 = scmp.lt.s32.totalorder %s720_s24, %s720_s24 }
  0x2b   : > { %p723_p1 = pnand %p721_p6, %p707_p13 }
  0x2c   : > { %p730_p12 = por %p729_p2, %p728_p8 }
  0x2d   : > { %p724_p4 = pneg %p723_p1 }
  0x2f   : > { %p731_p0 = pnand %p730_p12, %p724_p4 }
  0x31   : > { %734 = shalt.err (!%p731_p0)
}
  0x32   : > { %s892_s25 = smov [#allocation6]   ;;  %s227_s7 = sshll.u32 %s1247_s4, 4  ;;  %s228_s7 = int_to_ptr.vmem [resolvable:$true] %s227_s7 }
  0x33   : > { %621 = dma.vmem_to_smem (!%p1000_p11), %s195_s11, 16, %s892_s25, [#allocation5]  }
  0x34   : > { %s735_s9 = scalar_lea.vmem %s1007_s15, 16  ;;  %p743_p4 = scmp.lt.s32.totalorder %s1007_s15, %s1007_s15 }
  0x35   : > { %p736_p6 = scmp.ne.s32.totalorder %s1007_s15, %s735_s9  ;;  %p744_p8 = scmp.lt.s32.totalorder %s735_s9, %s735_s9 }
  0x37   : > { %p738_p1 = pnand %p736_p6, %p707_p13  ;;  %p745_p9 = por %p744_p8, %p743_p4 }
  0x39   : > { %p739_p2 = pneg %p738_p1 }
  0x3b   : > { %p746_p3 = pnand %p745_p9, %p739_p2 }
  0x3d   : > { %749 = shalt.err (!%p746_p3)
}
  0x3e   : > { %s893_s10 = smov [#allocation9]   ;;  %s750_s11 = scalar_lea.vmem %s228_s7, 16 }
  0x3f   : > { %627 = dma.vmem_to_smem (!%p1000_p11), %s1007_s15, 16, %s893_s10, [#allocation8]  }
  0x40   : > { %p751_p5 = scmp.ne.s32.totalorder %s228_s7, %s750_s11  ;;  %p758_p12 = scmp.lt.s32.totalorder %s228_s7, %s228_s7 }
  0x41   : > { %p759_p0 = scmp.lt.s32.totalorder %s750_s11, %s750_s11 }
  0x42   : > { %p753_p7 = pnand %p751_p5, %p707_p13 }
  0x43   : > { %p760_p6 = por %p759_p0, %p758_p12 }
  0x44   : > { %p754_p10 = pneg %p753_p7 }
  0x46   : > { %p761_p1 = pnand %p760_p6, %p754_p10 }
  0x48   : > { %764 = shalt.err (!%p761_p1)
}
  0x49   : > { %s894_s13 = smov [#allocation10]   ;;  %s36_s14 = sadd.s32 1, %s885_s22 }
  0x4a   : > { %630 = dma.vmem_to_smem (!%p1000_p11), %s228_s7, 16, %s894_s13, [#allocation11]  }
  0x4b   : > { %s45_s15 = sadd.s32 1, %s877_s20  ;;  %p38_p13 = scmp.ge.s32.totalorder %s36_s14, 2 }
  0x4c   : > { %p52_p2 = scmp.ne.s32.totalorder %s877_s20, %s873_s19  ;;  %p53_p4 = scmp.eq.s32.totalorder %s889_s23, 0 }
  0x4d   : > { %p643_p8 = scmp.lt.s32.totalorder %s889_s23, 2  ;;  %s1279_s14 = smov (%p38_p13, %s36_s14), 0 }
  0x4e   : > { %p54_p9 = por %p53_p4, %p52_p2  ;;  %p1264_p3 = scmp.ne.s32.totalorder %s1257_s27, 0 }
  0x4f   : > { %s40_s16 = ssub.s32 %s885_s22, %s1279_s14  ;;  %s238_s17 = sand.u32 1, %s877_s20  }
  0x50   : > { %p1049_p5 = por %p1264_p3, %p52_p2  ;;  %p43_p7 = scmp.eq.s32.totalorder %s40_s16, 0 }
  0x51   : > { %s559_s24 = sshll.u32 %s238_s17, 3  ;;  %s595_s25 = sshll.u32 %s885_s22, 7 }
  0x52   : > { %s1058_s30 = scalar_select %p43_p7, %s877_s20, %s45_s15  }
  0x53   : > { %s1266_s0 = sld [smem:[#allocation18_spill]]  ;;  %s242_s27 = scalar_lea.vmem [#allocation2], %s559_s24 }
  0x54   : > { %s250_s10 = sshll.u32 %s242_s27, 4  ;;  %p1067_p11 = pnand %p643_p8, %p54_p9  ;;  %s1071_s10 = int_to_ptr.vmem [resolvable:$true] %s250_s10 }
  0x55   : > { %s1073_s13 = scalar_lea.sflag [#allocation3], %s238_s17 }
  0x56   : > { %p767_p12 = pneg %p1067_p11 }
  0x59   : > { %s1063_s9 = scalar_lea.hbm %s1266_s0, %s595_s25  ;;  %s770_s25 = scalar_lea.hbm %s1266_s0, 256 }
  0x5a   : > { %s765_s15 = scalar_lea.hbm %s1063_s9, 128  ;;  %p771_p1 = scmp.lt.u32.totalorder %s1063_s9, %s1266_s0 }
  0x5b   : > { %p766_p10 = scmp.ne.s32.totalorder %s1063_s9, %s765_s15  ;;  %p772_p13 = scmp.lt.u32.totalorder %s770_s25, %s765_s15 }
  0x5c   : > { %p774_p4 = scmp.lt.u32.totalorder %s765_s15, %s1063_s9 }
  0x5d   : > { %p768_p0 = pnand %p767_p12, %p766_p10  ;;  %p773_p2 = por %p772_p13, %p771_p1 }
  0x5f   : > { %p769_p6 = pneg %p768_p0  ;;  %p775_p8 = por %p774_p4, %p773_p2 }
  0x61   : > { %p776_p9 = pnand %p775_p8, %p769_p6 }
  0x63   : > { %779 = shalt.err (!%p776_p9)
}
  0x64   : > { %s780_s17 = scalar_lea.vmem %s1071_s10, 128  ;;  %s895_s27 = smov [#allocation2]  }
  0x65   : > { %p781_p3 = scmp.ne.s32.totalorder %s1071_s10, %s780_s17  ;;  %s785_s16 = sshll.u32 %s895_s27, 4  ;;  %s786_s16 = int_to_ptr.vmem [resolvable:$false] %s785_s16 }
  0x66   : > { %s787_s24 = scalar_lea.vmem %s786_s16, 256  ;;  %p788_p0 = scmp.lt.s32.totalorder %s1071_s10, %s786_s16 }
  0x67   : > { %p783_p7 = pnand %p781_p3, %p767_p12  ;;  %p789_p1 = scmp.lt.s32.totalorder %s787_s24, %s780_s17 }
  0x69   : > { %p784_p10 = pneg %p783_p7  ;;  %p790_p13 = por %p789_p1, %p788_p0 }
  0x6b   : > { %p791_p2 = pnand %p790_p13, %p784_p10 }
  0x6d   : > { %794 = shalt.err (!%p791_p2)
}
  0x6e   : > { %s896_s15 = smov 32   ;;  %s897_s25 = smov 2  }
  0x6f   : > { %634 = dma.hbm_to_vmem [thread:$0]  (!%p1067_p11), %s1063_s9, 128, %s1071_s10, %s1073_s13, %s896_s15, %s896_s15, %s897_s25  }
  0x70   : > { %p1268_p12 = scmp.ne.s32.totalorder %s1261_s8, 0 }
  0x71   : > { %s1104_s6 = sand.u32 (!%p1268_p12), 1, %s873_s19   ;;  %p1269_p6 = scmp.ne.s32.totalorder (!%p1268_p12), %s1258_s28, 0 }
  0x72   : > { %262 = sbr.rel (%p1268_p12) target bundleno = 174 (0xae), region = 40  ;;  %s563_s7 = sshll.u32 (!%p1268_p12), %s1104_s6, 3 }
  0x73   : > { %s265_s17 = scalar_lea.sflag (!%p1268_p12), [#allocation3], %s1104_s6  ;;  %s1108_s27 = scalar_lea.vmem (!%p1268_p12), [#allocation2], %s563_s7 }
  0x79   : > { %848 = dma.done.wait (%p1269_p6), %s265_s17, 128  }
  0x7a   : > { %850 = vsyncadd (%p1269_p6), %s265_s17, 4294967168  ;;  %p1270_p11 = scmp.ne.s32.totalorder %s1256_s26, 0 }
  0x7c   : > { %852 = dma.done.wait (%p1270_p11), [#allocation5], 16  }
  0x7d   : > { %854 = vsyncadd (%p1270_p11), [#allocation5], 4294967280 }
  0x7e   : > { %856 = dma.done.wait (%p1270_p11), [#allocation8], 32  }
  0x7f   : > { %858 = vsyncadd (%p1270_p11), [#allocation8], 4294967264 }
  0x80   : > { %860 = dma.done.wait (%p1270_p11), [#allocation11], 16  }
  0x81   : > { %862 = vsyncadd (%p1270_p11), [#allocation11], 4294967280 }
  0x82   : > { %289 = sfence }
  0x83   : > { %s319_s28 = sld [smem:[#allocation6]]  ;;  %s573_s11 = sld [smem:[#allocation6 + $0x1]]  ;;  %v318_v0 = vld [vmem:[%s1108_s27] sm:$0x3]  ;;  %v572_v3 = vld [vmem:[%s1108_s27 + $0x2] sm:$0x3] }
  0x84   : > { %s322_s8 = sld [smem:[#allocation7]]  ;;  %s1130_s13 = sld [smem:[#allocation7 + $0x1]]  ;;  %v578_v5 = vld [vmem:[%s1108_s27 + $0x4] sm:$0x3]  ;;  %v584_v11 = vld [vmem:[%s1108_s27 + $0x6] sm:$0x3] }
  0x85   : > { %s1126_s9 = sld [smem:[#allocation10]]  ;;  %s1132_s16 = sld [smem:[#allocation9 + $0x1]] }
  0x86   : > { %s1128_s10 = sld [smem:[#allocation9]]  ;;  %s579_s24 = sld [smem:[#allocation6 + $0x2]] }
  0x87   : > { %s1135_s26 = sld [smem:[#allocation7 + $0x2]]  ;;  %s1139_s25 = sld [smem:[#allocation6 + $0x3]] }
  0x88   : > { %s1137_s15 = sld [smem:[#allocation9 + $0x2]]  ;;  %s1141_s7 = sld [smem:[#allocation7 + $0x3]] }
  0x89   : > { %v320_v1 = vstv %s319_s28  ;;  %s1144_s17 = sld [smem:[#allocation9 + $0x3]]  ;;  %s1147_s0 = sld [smem:[#allocation10 + $0x1]]  ;;  %v342_v6 = vstv %s573_s11 }
  0x8a   : > { %v323_v2 = vstv %s322_s8  ;;  %v321_v4 = vmul.f32 %v320_v1, %v318_v0  ;;  %v345_v7 = vstv %s1130_s13  ;;  %s1150_s1 = sld [smem:[#allocation9 + $0x4]]  ;;  %s1152_s2 = sld [smem:[#allocation9 + $0x5]]  ;;  %v343_v9 = vmul.f32 %v572_v3, %v342_v6 }
  0x8b   : > { %s1155_s28 = sld [smem:[#allocation9 + $0x6]]  ;;  %s1157_s8 = sld [smem:[#allocation9 + $0x7]]  ;;  %v313_v12 = vstv %s1126_s9  ;;  %v350_v20 = vstv %s1132_s16 }
  0x8c   : > { %v324_v8 = vadd.f32 %v323_v2, %v321_v4  ;;  %v364_v10 = vstv %s579_s24  ;;  %v328_v13 = vstv %s1128_s10  ;;  %s1162_s11 = sld [smem:[#allocation10 + $0x2]]  ;;  %s1164_s13 = sld [smem:[#allocation9 + $0x8]]  ;;  %v346_v17 = vadd.f32 %v345_v7, %v343_v9 }
  0x8d   : > { %v365_v14 = vmul.f32 %v578_v5, %v364_v10  ;;  %v367_v15 = vstv %s1135_s26  ;;  %v386_v18 = vstv %s1139_s25  ;;  %s1168_s27 = sld [smem:[#allocation9 + $0x9]]  ;;  %s1172_s9 = sld [smem:[#allocation9 + $0xa]] }
  0x8e   : > { %v325_v16 = vmul.f32 0.1, %v324_v8  ;;  %v389_v19 = vstv %s1141_s7  ;;  %v372_v22 = vstv %s1137_s15  ;;  %v387_v23 = vmul.f32 %v584_v11, %v386_v18  ;;  %s1178_s10 = sld [smem:[#allocation9 + $0xb]]  ;;  %s596_s24 = smul.u32 6, %s1104_s6 }
  0x8f   : > { %v368_v21 = vadd.f32 %v367_v15, %v365_v14  ;;  %v347_v25 = vmul.f32 0.1, %v346_v17  ;;  %v394_v26 = vstv %s1144_s17  ;;  %v315_v27 = vstv %s1147_s0  ;;  %s411_s25 = scalar_lea.sflag [#allocation4], %s1104_s6 }
  0x90   : > { %v326_v24 = vmax.f32 %v324_v8, %v325_v16  ;;  %v390_v29 = vadd.f32 %v389_v19, %v387_v23  ;;  %v332_v30 = vstv %s1150_s1  ;;  %v354_v31 = vstv %s1152_s2  ;;  %s311_s0 = scalar_lea.vmem [#allocation12], %s596_s24  ;;  %s597_s2 = smul.u32 96, %s881_s21 }
  0x91   : > { %v369_v28 = vmul.f32 0.1, %v368_v21  ;;  %v348_v33 = vmax.f32 %v346_v17, %v347_v25  ;;  %v376_v35 = vstv %s1155_s28  ;;  %v398_v38 = vstv %s1157_s8  ;;  %s425_s1 = sshll.u32 %s311_s0, 4  ;;  %s898_s21 = smov [#allocation12]   ;;  %s1189_s1 = int_to_ptr.vmem [resolvable:$true] %s425_s1 }
  0x92   : > { %v329_v32 = vmul.f32 %v328_v13, %v326_v24  ;;  %v333_v34 = vmul.f32 %v332_v30, %v326_v24  ;;  %v391_v37 = vmul.f32 0.1, %v390_v29  ;;  %v317_v39 = vstv %s1162_s11  ;;  %s1194_s15 = scalar_lea.hbm %s1248_s5, %s597_s2  ;;  %s795_s7 = scalar_lea.vmem %s1189_s1, 96 }
  0x93   : > { %v370_v36 = vmax.f32 %v368_v21, %v369_v28  ;;  %v351_v41 = vmul.f32 %v350_v20, %v348_v33  ;;  %v355_v43 = vmul.f32 %v354_v31, %v348_v33  ;;  %v336_v47 = vstv %s1164_s13  ;;  %p796_p4 = scmp.ne.s32.totalorder %s1189_s1, %s795_s7  ;;  %s799_s17 = sshll.u32 %s898_s21, 4  ;;  %s800_s17 = int_to_ptr.vmem [resolvable:$false] %s799_s17 }
  0x94   : > { %v330_v40 = vadd.f32 %v329_v32, %v313_v12  ;;  %v334_v42 = vadd.f32 %v333_v34, %v315_v27  ;;  %v392_v45 = vmax.f32 %v390_v29, %v391_v37  ;;  %v337_v50 = vmul.f32 %v336_v47, %v326_v24  ;;  %s801_s28 = scalar_lea.vmem %s800_s17, 192  ;;  %p802_p3 = scmp.lt.s32.totalorder %s1189_s1, %s800_s17 }
  0x95   : > { %v373_v44 = vmul.f32 %v372_v22, %v370_v36  ;;  %v377_v46 = vmul.f32 %v376_v35, %v370_v36  ;;  %v358_v51 = vstv %s1168_s27  ;;  %v380_v55 = vstv %s1172_s9  ;;  %p797_p8 = pnand %p796_p4, %p1049_p5  ;;  %p803_p7 = scmp.lt.s32.totalorder %s801_s28, %s795_s7 }
  0x96   : > { %v352_v48 = vadd.f32 %v351_v41, %v330_v40  ;;  %v356_v49 = vadd.f32 %v355_v43, %v334_v42  ;;  %v395_v52 = vmul.f32 %v394_v26, %v392_v45  ;;  %v399_v53 = vmul.f32 %v398_v38, %v392_v45 }
  0x97   : > { %v359_v54 = vmul.f32 %v358_v51, %v348_v33  ;;  %v338_v58 = vadd.f32 %v337_v50, %v317_v39  ;;  %v381_v59 = vmul.f32 %v380_v55, %v370_v36  ;;  %v402_v60 = vstv %s1178_s10  ;;  %p798_p9 = pneg %p797_p8  ;;  %p804_p10 = por %p803_p7, %p802_p3 }
  0x98   : > { %v374_v56 = vadd.f32 %v373_v44, %v352_v48  ;;  %v378_v57 = vadd.f32 %v377_v46, %v356_v49  ;;  %v403_v0 = vmul.f32 %v402_v60, %v392_v45 }
  0x99   : > { %v360_v63 = vadd.f32 %v359_v54, %v338_v58  ;;  %p805_p0 = pnand %p804_p10, %p798_p9 }
  0x9a   : > { %v396_v61 = vadd.f32 %v395_v52, %v374_v56  ;;  %v400_v62 = vadd.f32 %v399_v53, %v378_v57 }
  0x9b   : > { %v382_v1 = vadd.f32 %v381_v59, %v360_v63 }
  0x9c   : > { %405 = vst [vmem:[%s311_s0] sm:$0x3] %v396_v61  ;;  %590 = vst [vmem:[%s311_s0 + $0x2] sm:$0x3] %v400_v62 }
  0x9d   : > { %v404_v2 = vadd.f32 %v403_v0, %v382_v1 }
  0x9f   : > { %591 = vst [vmem:[%s311_s0 + $0x4] sm:$0x3] %v404_v2 }
  0xa0   : > { %808 = shalt.err (!%p805_p0)
}
  0xa1   : > { %s809_s8 = scalar_lea.hbm %s1194_s15, 96  ;;  %s813_s27 = scalar_lea.hbm %s1248_s5, 192 }
  0xa2   : > { %p810_p1 = scmp.ne.s32.totalorder %s1194_s15, %s809_s8  ;;  %p814_p12 = scmp.lt.u32.totalorder %s1194_s15, %s1248_s5 }
  0xa3   : > { %p815_p6 = scmp.lt.u32.totalorder %s813_s27, %s809_s8  ;;  %p817_p4 = scmp.lt.u32.totalorder %s809_s8, %s1194_s15 }
  0xa4   : > { %p811_p13 = pnand %p810_p1, %p1049_p5 }
  0xa5   : > { %p816_p11 = por %p815_p6, %p814_p12 }
  0xa6   : > { %p812_p2 = pneg %p811_p13 }
  0xa7   : > { %p818_p8 = por %p817_p4, %p816_p11 }
  0xa9   : > { %p819_p9 = pnand %p818_p8, %p812_p2 }
  0xab   : > { %822 = shalt.err (!%p819_p9)
}
  0xac   : > { %s899_s24 = smov 32   ;;  %s900_s0 = smov 2  }
  0xad   : > { %616 = dma.vmem_to_hbm [thread:$0]  (%p1049_p5), %s1189_s1, 96, %s1194_s15, %s411_s25, %s899_s24, %s899_s24, %s900_s0  }
  0xae PF: > { %s440_s2 = sand.u32 1, %s869_s18   ;;  %p1271_p3 = scmp.ne.s32.totalorder %s1259_s29, 0 }
  0xaf   : > { %p1272_p7 = scmp.ge.s32.totalorder %s889_s23, 2  ;;  %s441_s16 = scalar_lea.sflag [#allocation4], %s440_s2 }
  0xb1   : > { %p636_p10 = pnand %p1272_p7, %p1271_p3 }
  0xb3   : > { %864 = dma.done.wait (!%p636_p10), %s441_s16, 96  }
  0xb4   : > { %866 = vsyncadd (!%p636_p10), %s441_s16, 4294967200  ;;  %s24_s23 = sadd.s32 1, %s889_s23   ;;  %s1273_s18 = smov %s873_s19 }
  0xb5   : > { %p21_p0 = scmp.ge.s32.totalorder %s24_s23, 4   ;;  %s1274_s19 = smov %s877_s20 }
  0xb6   : > { %s1275_s20 = smov %s1058_s30  ;;  %s1276_s21 = smov %s885_s22 }
  0xb7   : > { %s1277_s22 = smov %s1279_s14  ;;  %23 = sbr.rel (!%p21_p0) target bundleno = 13 (0xd), region = 107 }
  0xbe   :  { %446 = vsyncpa [#allocation3], 1 }
  0xbf   :  { %448 = vsyncpa [#allocation3 + $0x1], 1 }
  0xc0   :  { %449 = vsyncpa [#allocation4], 1 }
  0xc1   :  { %451 = vsyncpa [#allocation4 + $0x1], 1 }
  0xc2   :  { %452 = vsyncpa [#allocation5], 1 }
  0xc3   :  { %454 = vsyncpa [#allocation5 + $0x1], 1 }
  0xc4   :  { %455 = vsyncpa [#allocation8], 1 }
  0xc5   :  { %456 = vsyncpa [#allocation11], 1 }

</bundles_post_ra>
